<compile_context>
chip_gen: v6e
topology: v6e:2x2x1
jax: 0.10.0
libtpu: 0.0.40
codegen_flags: <defaults>
</compile_context>

<pallas_src>
import functools

import jax
import jax.numpy as jnp
import numpy as np
from jax import lax
from jax.experimental import pallas as pl


def _transition_up_kernel(x_ref, wb_ref, o_ref):
    """ConvTranspose2d(k=2, s=2, p=0, bias=True) as a single MXU matmul.

    x_ref : (Cin+1, N*H*W) bf16 -- activations with an all-ones last row (bias term).
    wb_ref: (K4, Cin+1)    bf16 -- rows ordered (co, kh, kw); last column is the bias.
    o_ref : (K4, N*H*W)         -- lane-dense output slab.
    """
    o_ref[...] = jnp.dot(wb_ref[...], x_ref[...],
                         preferred_element_type=jnp.float32).astype(o_ref.dtype)


def pack_transition_up_params(weight_iohw, bias):
    """Pack ConvTranspose2d params ONCE per module (hoisted out of the per-call path).

    weight_iohw: (Cin, Cout, KH, KW) (PyTorch ConvTranspose2d layout); bias: (Cout,).
    Returns a (K4, Cin+1) bf16 tile: [ weight rows ordered (co,kh,kw) | bias column ].
    """
    cin, cout, kh, kw = weight_iohw.shape
    k4 = cout * kh * kw
    w2 = jnp.transpose(weight_iohw, (1, 2, 3, 0)).reshape(k4, cin)   # rows: (co, kh, kw)
    b2 = jnp.repeat(bias, kh * kw).reshape(k4, 1)
    return jnp.concatenate([w2, b2], axis=1).astype(jnp.bfloat16)


@functools.partial(jax.jit, static_argnames=("cout", "kh", "kw", "out_dtype"))
def transition_up_forward(x_nchw, wb, *, cout, kh, kw, out_dtype=jnp.float32):
    """TransitionUp.forward. x_nchw: (N, Cin, H, W); wb: packed (K4, Cin+1) params.

    Returns (N, Cout, 2H, 2W), matching PyTorch.
    """
    n, cin, h, w = x_nchw.shape
    p = h * w
    l = n * p
    k4 = cout * kh * kw

    # Merge batch into lanes and fold the bias into the contraction:
    #   columns ordered (n, h, w); last row is all ones.
    x2 = jnp.transpose(x_nchw.reshape(n, cin, p), (1, 0, 2)).reshape(cin, l)
    x_aug = jnp.pad(x2, ((0, 1), (0, 0)), constant_values=1.0).astype(jnp.bfloat16)

    z = pl.pallas_call(
        _transition_up_kernel,
        out_shape=jax.ShapeDtypeStruct((k4, l), out_dtype),
        grid=(1,),                                                   # single step: no per-step overhead
        in_specs=[pl.BlockSpec((cin + 1, l), lambda i: (0, 0)),      # full array, 512-lane dense
                  pl.BlockSpec((k4, cin + 1), lambda i: (0, 0))],    # tiny resident weight|bias tile
        out_specs=pl.BlockSpec((k4, l), lambda i: (0, 0)),           # lane-dense unmasked stores
        # TODO(synk): when Cin / H*W scale up, tile the lane axis into 128-multiple chunks sized
        # against v7x's 64 MiB (32 MiB default-scoped) VMEM and set vmem_limit_bytes explicitly;
        # optionally store the slab in bf16 if the consumer tolerates it (halves writeback bytes).
    )(x_aug, wb)

    # Depth-to-space back to PyTorch NCHW:
    # (Cout, KH, KW, N, H, W) -> (N, Cout, H, KH, W, KW) -> (N, Cout, 2H, 2W)
    y = z.reshape(cout, kh, kw, n, h, w)
    y = jnp.transpose(y, (3, 0, 4, 1, 5, 2))
    return y.reshape(n, cout, h * kh, w * kw)


def reference_forward(x_nchw, weight_iohw, bias):
    """Pure-JAX reference: ConvTranspose2d == lhs-dilated conv with the spatially flipped kernel."""
    _, cout, kh, kw = weight_iohw.shape
    k_rot = jnp.transpose(jnp.flip(weight_iohw, axis=(2, 3)), (1, 0, 2, 3))   # (Cout, Cin, KH, KW)
    y = lax.conv_general_dilated(
        x_nchw, k_rot, window_strides=(1, 1),
        padding=[(kh - 1, kh - 1), (kw - 1, kw - 1)],
        lhs_dilation=(2, 2),
        dimension_numbers=("NCHW", "OIHW", "NCHW"),
        precision=lax.Precision.HIGHEST)
    return y + bias.reshape(1, -1, 1, 1)


if __name__ == "__main__":
    # Module config: TransitionUp(in_channels=4) -> ConvTranspose2d(4, 2, kernel_size=2, stride=2)
    N, Cin, H, W = 2, 4, 16, 16
    Cout, K = Cin // 2, 2

    key = jax.random.PRNGKey(0)
    k_x, k_w, k_b = jax.random.split(key, 3)

    x = jax.random.normal(k_x, (N, Cin, H, W), dtype=jnp.float32)

    # Deterministic xavier-uniform weight (Cin, Cout, KH, KW) + PyTorch-style uniform bias.
    xav_bound = float(np.sqrt(6.0 / ((Cin + Cout) * K * K)))
    weight = jax.random.uniform(k_w, (Cin, Cout, K, K), jnp.float32, -xav_bound, xav_bound)
    b_bound = float(1.0 / np.sqrt(Cout * K * K))
    bias = jax.random.uniform(k_b, (Cout,), jnp.float32, -b_bound, b_bound)

    # Pack params once per module (hoisted out of the forward path), then run the kernel.
    wb = pack_transition_up_params(weight, bias)
    out = jax.block_until_ready(transition_up_forward(x, wb, cout=Cout, kh=K, kw=K))
    assert out.shape == (N, Cout, 2 * H, 2 * W), out.shape

    # Apples-to-apples check: reference fed the same bf16-rounded inputs the MXU sees,
    # with f32 accumulation -> tight tolerance verifies structure/indexing exactly.
    q = lambda a: a.astype(jnp.bfloat16).astype(jnp.float32)
    ref_q = jax.block_until_ready(reference_forward(q(x), q(weight), q(bias)))
    np.testing.assert_allclose(np.asarray(out), np.asarray(ref_q), atol=1e-5, rtol=1e-5)

    # Sanity check against the full-f32 reference (loose bound covers bf16 input rounding).
    ref_f32 = jax.block_until_ready(reference_forward(x, weight, bias))
    np.testing.assert_allclose(np.asarray(out), np.asarray(ref_f32), atol=1e-1, rtol=1e-1)

    print("KERNEL_OK")
</pallas_src>

<mosaic_0001>
module attributes {stable_mosaic.version = 11 : i64} {
  func.func @_transition_up_kernel(%arg0: i32, %arg1: memref<5x512xbf16, #tpu.memory_space<vmem>>, %arg2: memref<8x5xbf16, #tpu.memory_space<vmem>>, %arg3: memref<8x512xf32, #tpu.memory_space<vmem>>) attributes {dimension_semantics = [#tpu.dimension_semantics<arbitrary>], iteration_bounds = array<i64: 1>, scalar_prefetch = 0 : i64, scratch_operands = 0 : i64, tpu.core_type = #tpu.core_type<tc>, window_params = [{pipeline_mode = #tpu.pipeline_mode<synchronous>, transform_indices = @transform_0, window_bounds = array<i64: 5, 512>}, {pipeline_mode = #tpu.pipeline_mode<synchronous>, transform_indices = @transform_1, window_bounds = array<i64: 8, 5>}, {pipeline_mode = #tpu.pipeline_mode<synchronous>, transform_indices = @transform_2, window_bounds = array<i64: 8, 512>}]} {
    %c0 = arith.constant 0 : index
    %c0_0 = arith.constant 0 : index
    %0 = vector.load %arg2[%c0, %c0_0] : memref<8x5xbf16, #tpu.memory_space<vmem>>, vector<8x5xbf16>
    %c0_1 = arith.constant 0 : index
    %c0_2 = arith.constant 0 : index
    %1 = vector.load %arg1[%c0_1, %c0_2] : memref<5x512xbf16, #tpu.memory_space<vmem>>, vector<5x512xbf16>
    %cst = arith.constant dense<0.000000e+00> : vector<8x512xf32>
    %2 = tpu.matmul %0, %1, %cst {dimension_numbers = #tpu.dot_dimension_numbers<[1], [0], [0], [1], [0, 0, 1, 1], [], []>} : vector<8x5xbf16>, vector<5x512xbf16>, vector<8x512xf32> -> vector<8x512xf32>
    %c0_3 = arith.constant 0 : index
    %c0_4 = arith.constant 0 : index
    %3 = vector.load %arg3[%c0_3, %c0_4] : memref<8x512xf32, #tpu.memory_space<vmem>>, vector<8x512xf32>
    tpu.vector_store %arg3[%c0_3, %c0_4], %2 {strides = array<i32>} : memref<8x512xf32, #tpu.memory_space<vmem>>, vector<8x512xf32>,
    return
  }
  func.func @transform_0(%arg0: i32) -> (i32, i32) {
    %c0_i32 = arith.constant 0 : i32
    %c0_i32_0 = arith.constant 0 : i32
    %c0_i32_1 = arith.constant 0 : i32
    return %c0_i32, %c0_i32_0 : i32, i32
  }
  func.func @transform_1(%arg0: i32) -> (i32, i32) {
    %c0_i32 = arith.constant 0 : i32
    %c0_i32_0 = arith.constant 0 : i32
    %c0_i32_1 = arith.constant 0 : i32
    return %c0_i32, %c0_i32_0 : i32, i32
  }
  func.func @transform_2(%arg0: i32) -> (i32, i32) {
    %c0_i32 = arith.constant 0 : i32
    %c0_i32_0 = arith.constant 0 : i32
    %c0_i32_1 = arith.constant 0 : i32
    return %c0_i32, %c0_i32_0 : i32, i32
  }
}

</mosaic_0001>

<bundles_post_ra>
// kernel: transition_up_forward.1
= control target key start
LH: loop header
LB: loop body
LE: loop exit
PB: predicated region body
PF: predicated region fallthrough
CT: control target
= control target key end

     0   :  { %vm29_vm0 = vcmask 1041408   ;;  %vm30_vm1 = vcmask 1042432   ;;  %v147_v1 = vmov 65535   ;;  %v148_v4 = vmov 0   ;;  %s185_s0 = inlined_call_operand.vmem [shape: bf16[5,512], index: 0, kind: input, shape index: {}]   ;;  %s186_s1 = inlined_call_operand.vmem [shape: bf16[8,5], index: 1, kind: input, shape index: {}]   ;;  %s187_s2 = inlined_call_operand.vmem [shape: f32[8,512], index: 2, kind: output, shape index: {}]  }
   0x1   :  { %v13_v0 = vld [vmem:[%s185_s0] sm:$0x77]  ;;  %v31_v2 = vsel %vm29_vm0, 4294967295, %v147_v1  ;;  %v14_v3 = vld [vmem:[%s185_s0 + $0x8] sm:$0x77]  ;;  %77 = vmatprep.mubr.bf16.mxu0 %v148_v4  ;;  %118 = vmatprep.mubr.bf16.mxu1 %v148_v4  ;;  %vm25_vm2 = vcmask 39936  }
   0x2   :  { %v136_v5 = vcombine.high %v13_v0, %v13_v0  ;;  %v32_v6 = vsel %vm30_vm1, %v31_v2, 0  ;;  %v138_v7 = vcombine.high %v14_v3, %v14_v3  ;;  %v135_v8 = vcombine.low %v13_v0, %v13_v0  ;;  %v12_v14 = vld [vmem:[%s186_s1] sm:$0xf] }
   0x3   :  { %v137_v9 = vcombine.low %v14_v3, %v14_v3 }
   0x4   :  { %v37_v10 = vand.u32 %v136_v5, %v32_v6  ;;  %v43_v11 = vand.u32 %v138_v7, %v32_v6  ;;  %v34_v12 = vand.u32 %v135_v8, %v32_v6 }
   0x5   :  { %v40_v13 = vand.u32 %v137_v9, %v32_v6 }
   0x6   :  { %59 = vmatprep.subr.bf16.mxu0 %v37_v10  ;;  %100 = vmatprep.subr.bf16.mxu1 %v43_v11 }
   0x7   :  { %60 = vmatpush1.bf16.msra.mxu0 %v34_v12  ;;  %101 = vmatpush1.bf16.msra.mxu1 %v40_v13 }
   0xa   :  { %139 = vmatmul.mubr.msk.bf16.vlgmr.msra.gmra.mxu0 %vm25_vm2, %v12_v14  ;;  %140 = vmatmul.mubr.msk.bf16.vlgmr.msra.gmra.mxu1 %vm25_vm2, %v12_v14 }
  0xca   :  { %v79_v15 = vpop.f32.mrf.mxu0  ;;  %v120_v16 = vpop.f32.mrf.mxu1 }
  0xcb   :  { %127 = vst [vmem:[%s187_s2] sm:$0xff] %v79_v15  ;;  %129 = vst [vmem:[%s187_s2 + $0x10] sm:$0xff] %v120_v16 }
  0xcc   :  { %v81_v17 = vpop.f32.mrf.mxu0  ;;  %v122_v18 = vpop.f32.mrf.mxu1 }
  0xcd   :  { %128 = vst [vmem:[%s187_s2 + $0x8] sm:$0xff] %v81_v17  ;;  %130 = vst [vmem:[%s187_s2 + $0x18] sm:$0xff] %v122_v18 }
  0xce   :  { %v83_v19 = vpop.f32.mrf.mxu0  ;;  %v124_v20 = vpop.f32.mrf.mxu1 }
  0xd0   :  { %v84_v21 = vpop.f32.mrf.mxu0  ;;  %v125_v22 = vpop.f32.mrf.mxu1 }

</bundles_post_ra>
